<compile_context>
chip_gen: v5e
topology: v5e:2x2
jax: 0.10.0
libtpu: 0.0.40
codegen_flags: <defaults>
</compile_context>

<pallas_src>
import functools

import jax
import jax.numpy as jnp
from jax.experimental import pallas as pl
from jax.experimental.pallas import tpu as pltpu

_MARGIN = 128  # lane-aligned halo margin inside the per-tile v scratch


def _focus_fused_kernel(x_ref, halo_ref, wv_ref, bv_ref, wt_ref, wo_ref,
                        bo_ref, o_ref, vbuf, *, t_total, t_tile, ksize, pad,
                        t_axis, mask_main, has_halo):
    """to_out(rel_pos(to_v(bn(x)))) for one (batch, T-tile) block.

    x_ref:    (C, tT)       input tile (original dtype)
    halo_ref: (C, 2*pad)    x columns just left/right of the tile
    wv_ref:   (inner, C)    BN-scale-folded to_v weight (compute dtype)
    bv_ref:   (inner, 1)    Wv @ bn_shift                (f32)
    wt_ref:   (inner, K)    per-channel depthwise taps   (f32)
    wo_ref:   (C, inner)    to_out weight (compute dtype)
    bo_ref:   (C, 1)        Wo @ b_rel_full + b_o        (f32)
    o_ref:    (C, tT)       output tile
    vbuf:     (inner, 2*_MARGIN + tT) f32 VMEM scratch (padded v slab)
    """
    f32 = jnp.float32
    cdt = wv_ref.dtype
    inner = wv_ref.shape[0]
    t0 = pl.program_id(t_axis) * t_tile

    # ---- to_v on the main tile columns (BN already folded into wv / bv) ----
    xm = x_ref[...]
    if xm.dtype != cdt:
        xm = xm.astype(cdt)
    v_main = jnp.dot(wv_ref[...], xm, preferred_element_type=f32)
    bv = bv_ref[...]
    if mask_main:
        # Ragged last tile: columns past T hold garbage (partial block read)
        # and must also act as the conv's zero padding -> zero them AFTER the
        # matmul, before the depthwise conv consumes them.
        col = jax.lax.broadcasted_iota(jnp.int32, v_main.shape, 1) + t0
        v_main = jnp.where(col < t_total, v_main + bv, 0.0)
    else:
        v_main = v_main + bv

    # ---- to_v on the 2*pad halo columns; place them in 128-wide margins ----
    left_m = jnp.zeros((inner, _MARGIN), f32)
    right_m = jnp.zeros((inner, _MARGIN), f32)
    if has_halo:
        xh = halo_ref[...]
        if xh.dtype != cdt:
            xh = xh.astype(cdt)
        v_halo = jnp.dot(wv_ref[...], xh, preferred_element_type=f32)
        j = jax.lax.broadcasted_iota(jnp.int32, v_halo.shape, 1)
        hcol = jnp.where(j < pad, t0 - pad + j, t0 + t_tile + (j - pad))
        v_halo = jnp.where((hcol >= 0) & (hcol < t_total), v_halo + bv, 0.0)
        lane = jax.lax.broadcasted_iota(jnp.int32, (inner, _MARGIN), 1)
        for m in range(pad):
            left_m = jnp.where(lane == _MARGIN - pad + m,
                               v_halo[:, m:m + 1], left_m)
            right_m = jnp.where(lane == m,
                                v_halo[:, pad + m:pad + m + 1], right_m)

    # ---- Assemble the padded v slab in VMEM (all stores lane-aligned) ----
    vbuf[:, 0:_MARGIN] = left_m
    vbuf[:, _MARGIN:_MARGIN + t_tile] = v_main
    vbuf[:, _MARGIN + t_tile:_MARGIN + t_tile + _MARGIN] = right_m

    # ---- rel_pos: depthwise temporal conv as K static shifted FMAs ----
    taps = wt_ref[...]
    u = None
    for k in range(ksize):
        win = vbuf[:, _MARGIN - pad + k:_MARGIN - pad + k + t_tile]
        term = taps[:, k:k + 1] * win
        u = term if u is None else u + term

    # ---- to_out (1x1 conv); rel_pos bias already folded into bo ----
    out = jnp.dot(wo_ref[...], u.astype(cdt), preferred_element_type=f32)
    o_ref[...] = (out + bo_ref[...]).astype(o_ref.dtype)


def _pick_t_tile(T, C, inner, t_tile, x_isz, c_isz):
    """Lane-dense T tile kept small enough that the double-buffered per-step
    footprint fits comfortably in the smallest (v5e) default scoped-VMEM."""
    if T <= t_tile:
        return T
    tT = max(128, (t_tile // 128) * 128)

    def footprint(tt):
        per_step = (C * tt * x_isz          # x tile
                    + C * tt * x_isz        # out tile
                    + C * 128 * x_isz       # halo tile (lane-padded)
                    + 2 * inner * C * c_isz)  # wv + wo
        scratch = inner * (tt + 2 * _MARGIN) * 4
        return 2 * per_step + scratch

    budget = 10 * 1024 * 1024
    while tT > 128 and footprint(tT) > budget:
        tT = max(128, ((tT // 2) // 128) * 128)
    return tT


def focus_forward(x, bn_gamma, bn_beta, bn_mean, bn_var,
                  w_v, w_rel, b_rel, w_o, b_o, *, heads,
                  eps=1e-5, t_tile=1024, compute_dtype=None):
    """FOCUS forward. x: (B, C, T). Conv weights in PyTorch layouts:
    w_v: (inner, C, 1), w_rel: (heads, 1, K), b_rel: (heads,),
    w_o: (C, inner, 1), b_o: (C,).

    compute_dtype: dtype for the MXU matmuls (weights are pre-cast, tiles are
    cast in-kernel so HBM traffic is unchanged).  None -> x.dtype; use
    jnp.bfloat16 for the fast MXU path on v5e/v6e/v7x.
    """
    B, C, T = x.shape
    inner = w_v.shape[0]
    assert inner % heads == 0, "inner_dim must be divisible by heads"
    dim_head = inner // heads
    K = w_rel.shape[-1]
    pad = K // 2

    f32 = jnp.float32
    cdt = jnp.dtype(compute_dtype) if compute_dtype is not None else x.dtype

    # ---- Fold BatchNorm1d (inference) into to_v: v = (Wv*scale)@x + Wv@shift
    scale = bn_gamma.astype(f32) / jnp.sqrt(bn_var.astype(f32) + eps)
    shift = bn_beta.astype(f32) - bn_mean.astype(f32) * scale
    wv = w_v.reshape(inner, C).astype(f32)
    wv_folded = (wv * scale[None, :]).astype(cdt)          # (inner, C)
    bias_v = (wv @ shift).reshape(inner, 1)                # (inner, 1), f32

    # ---- Expand grouped depthwise taps: channel ci -> head ci % heads ------
    w_full = jnp.tile(w_rel.reshape(heads, K).astype(f32), (dim_head, 1))
    b_full = jnp.tile(b_rel.reshape(heads).astype(f32), dim_head)
    if pad == 0:  # K == 1: add zero taps so the halo machinery stays uniform
        w_full = jnp.pad(w_full, ((0, 0), (1, 1)))
        K, pad = 3, 1

    # ---- Fold rel_pos bias through to_out: out = Wo@conv + (Wo@b_rel + b_o)
    wo = w_o.reshape(C, inner).astype(f32)
    bias_out = (wo @ b_full + b_o.astype(f32)).reshape(C, 1)   # (C, 1), f32
    wo_c = wo.astype(cdt)

    # ---- T tiling ------------------------------------------------------------
    tT = _pick_t_tile(T, C, inner, t_tile,
                      jnp.dtype(x.dtype).itemsize, cdt.itemsize)
    nT = pl.cdiv(T, tT)
    mask_main = (T % tT) != 0
    has_halo = nT > 1

    # ---- Per-tile conv halo: the 2*pad x-columns just outside each tile,
    # gathered once (reads ~2*pad/tT of x, <1%); out-of-range columns zeroed.
    tstart = jnp.arange(nT, dtype=jnp.int32) * tT
    offs = jnp.concatenate([jnp.arange(pad, dtype=jnp.int32) - pad,
                            jnp.arange(pad, dtype=jnp.int32) + tT])
    idx = tstart[:, None] + offs[None, :]                       # (nT, 2*pad)
    valid = (idx >= 0) & (idx < T)
    gath = jnp.take(x, jnp.clip(idx, 0, T - 1).reshape(-1), axis=2)
    gath = gath.reshape(B, C, nT, 2 * pad)
    halos = jnp.where(valid[None, None], gath, 0).transpose(0, 2, 1, 3)
    halos = halos.astype(x.dtype)                               # (B, nT, C, 2p)

    # ---- Grid: both axes parallel; larger axis leading so megacore / v7x
    # dual-TC shards the busy axis even when B (or nT) is tiny.
    if B >= nT:
        grid, t_axis = (B, nT), 1

        def im(fn):
            return lambda b, t: fn(b, t)
    else:
        grid, t_axis = (nT, B), 0

        def im(fn):
            return lambda t, b: fn(b, t)

    kern = functools.partial(
        _focus_fused_kernel, t_total=T, t_tile=tT, ksize=K, pad=pad,
        t_axis=t_axis, mask_main=mask_main, has_halo=has_halo)

    return pl.pallas_call(
        kern,
        out_shape=jax.ShapeDtypeStruct((B, C, T), x.dtype),
        grid_spec=pltpu.PrefetchScalarGridSpec(
            num_scalar_prefetch=0,
            grid=grid,
            in_specs=[
                pl.BlockSpec((None, C, tT), im(lambda b, t: (b, 0, t))),
                pl.BlockSpec((None, None, C, 2 * pad),
                             im(lambda b, t: (b, t, 0, 0))),
                pl.BlockSpec((inner, C), im(lambda b, t: (0, 0))),
                pl.BlockSpec((inner, 1), im(lambda b, t: (0, 0))),
                pl.BlockSpec((inner, K), im(lambda b, t: (0, 0))),
                pl.BlockSpec((C, inner), im(lambda b, t: (0, 0))),
                pl.BlockSpec((C, 1), im(lambda b, t: (0, 0))),
            ],
            out_specs=pl.BlockSpec((None, C, tT), im(lambda b, t: (b, 0, t))),
            scratch_shapes=[pltpu.VMEM((inner, 2 * _MARGIN + tT), jnp.float32)],
        ),
        compiler_params=pltpu.CompilerParams(
            dimension_semantics=("parallel", "parallel")),
    )(x, halos, wv_folded, bias_v, w_full, wo_c, bias_out)


def focus_ref(x, bn_gamma, bn_beta, bn_mean, bn_var,
              w_v, w_rel, b_rel, w_o, b_o, *, heads, eps=1e-5):
    """Pure-JAX reference mirroring the PyTorch FOCUS forward (inference BN)."""
    B, C, T = x.shape
    inner = w_v.shape[0]
    dim_head = inner // heads
    K = w_rel.shape[-1]
    pad = K // 2
    scale = bn_gamma / jnp.sqrt(bn_var + eps)
    shift = bn_beta - bn_mean * scale
    y = x * scale[None, :, None] + shift[None, :, None]
    v = jnp.einsum('oc,bct->bot', w_v.reshape(inner, C), y,
                   precision=jax.lax.Precision.HIGHEST)
    w_full = jnp.tile(w_rel.reshape(heads, K), (dim_head, 1))   # (inner, K)
    b_full = jnp.tile(b_rel.reshape(heads), dim_head)           # (inner,)
    vp = jnp.pad(v, ((0, 0), (0, 0), (pad, pad)))
    u = sum(w_full[None, :, k:k + 1] * vp[:, :, k:k + T] for k in range(K))
    u = u + b_full[None, :, None]
    out = jnp.einsum('co,bot->bct', w_o.reshape(C, inner), u,
                     precision=jax.lax.Precision.HIGHEST)
    return out + b_o[None, :, None]


if __name__ == "__main__":
    key = jax.random.PRNGKey(0)
    ks = jax.random.split(key, 10)

    heads, dim_head, K = 4, 16, 5
    inner = heads * dim_head

    def make_params(C):
        bn_gamma = 1.0 + 0.1 * jax.random.normal(ks[0], (C,), jnp.float32)
        bn_beta = 0.1 * jax.random.normal(ks[1], (C,), jnp.float32)
        bn_mean = 0.1 * jax.random.normal(ks[2], (C,), jnp.float32)
        bn_var = jnp.abs(jax.random.normal(ks[3], (C,), jnp.float32)) + 0.5
        w_v = 0.1 * jax.random.normal(ks[4], (inner, C, 1), jnp.float32)
        w_rel = 0.2 * jax.random.normal(ks[5], (heads, 1, K), jnp.float32)
        b_rel = 0.1 * jax.random.normal(ks[6], (heads,), jnp.float32)
        w_o = 0.1 * jax.random.normal(ks[7], (C, inner, 1), jnp.float32)
        b_o = 0.1 * jax.random.normal(ks[8], (C,), jnp.float32)
        return bn_gamma, bn_beta, bn_mean, bn_var, w_v, w_rel, b_rel, w_o, b_o

    # Case 1: single full-T tile (B-major grid, no halo path).
    B, C, T = 2, 32, 128
    params = make_params(C)
    x = jax.random.normal(ks[9], (B, C, T), dtype=jnp.float32)
    fwd = jax.jit(functools.partial(focus_forward, heads=heads))
    out = jax.block_until_ready(fwd(x, *params))
    ref = focus_ref(x, *params, heads=heads)
    assert out.shape == (B, C, T)
    assert jnp.allclose(out, ref, atol=1e-2, rtol=1e-2), "case1 mismatch"

    # Case 2: T-tiled path with cross-tile halos + ragged tail
    # (T=320, tT=128, nT=3; T-major grid since nT > B; partial last blocks).
    B2, C2, T2 = 2, 32, 320
    params2 = make_params(C2)
    x2 = jax.random.normal(ks[9], (B2, C2, T2), dtype=jnp.float32)
    fwd2 = jax.jit(functools.partial(focus_forward, heads=heads, t_tile=128))
    out2 = jax.block_until_ready(fwd2(x2, *params2))
    ref2 = focus_ref(x2, *params2, heads=heads)
    assert out2.shape == (B2, C2, T2)
    assert jnp.allclose(out2, ref2, atol=1e-2, rtol=1e-2), "case2 mismatch"

    # Case 3: bf16 MXU path (weights in bf16, tiles cast in-kernel,
    # f32 accumulation) -- the fast path on v5e/v6e/v7x.
    fwd3 = jax.jit(functools.partial(focus_forward, heads=heads, t_tile=128,
                                     compute_dtype=jnp.bfloat16))
    out3 = jax.block_until_ready(fwd3(x2, *params2))
    assert out3.shape == (B2, C2, T2)
    assert jnp.allclose(out3, ref2, atol=5e-2, rtol=5e-2), "case3 mismatch"

    print("KERNEL_OK")
</pallas_src>

<mosaic_0001>
module attributes {stable_mosaic.version = 11 : i64} {
  func.func @_focus_fused_kernel(%arg0: i32, %arg1: i32, %arg2: memref<1x32x128xf32, #tpu.memory_space<vmem>>, %arg3: memref<1x1x32x4xf32, #tpu.memory_space<vmem>>, %arg4: memref<64x32xf32, #tpu.memory_space<vmem>>, %arg5: memref<64x1xf32, #tpu.memory_space<vmem>>, %arg6: memref<64x5xf32, #tpu.memory_space<vmem>>, %arg7: memref<32x64xf32, #tpu.memory_space<vmem>>, %arg8: memref<32x1xf32, #tpu.memory_space<vmem>>, %arg9: memref<1x32x128xf32, #tpu.memory_space<vmem>>, %arg10: memref<64x384xf32, #tpu.memory_space<vmem>>) attributes {dimension_semantics = [#tpu.dimension_semantics<parallel>, #tpu.dimension_semantics<parallel>], iteration_bounds = array<i64: 2, 1>, scalar_prefetch = 0 : i64, scratch_operands = 1 : i64, tpu.core_type = #tpu.core_type<tc>, window_params = [{transform_indices = @transform_0, window_bounds = array<i64: 1, 32, 128>}, {transform_indices = @transform_1, window_bounds = array<i64: 1, 1, 32, 4>}, {pipeline_mode = #tpu.pipeline_mode<synchronous>, transform_indices = @transform_2, window_bounds = array<i64: 64, 32>}, {pipeline_mode = #tpu.pipeline_mode<synchronous>, transform_indices = @transform_3, window_bounds = array<i64: 64, 1>}, {pipeline_mode = #tpu.pipeline_mode<synchronous>, transform_indices = @transform_4, window_bounds = array<i64: 64, 5>}, {pipeline_mode = #tpu.pipeline_mode<synchronous>, transform_indices = @transform_5, window_bounds = array<i64: 32, 64>}, {pipeline_mode = #tpu.pipeline_mode<synchronous>, transform_indices = @transform_6, window_bounds = array<i64: 32, 1>}, {transform_indices = @transform_7, window_bounds = array<i64: 1, 32, 128>}]} {
    %c0 = arith.constant 0 : index
    %c0_0 = arith.constant 0 : index
    %c0_1 = arith.constant 0 : index
    %0 = vector.load %arg2[%c0, %c0_0, %c0_1] : memref<1x32x128xf32, #tpu.memory_space<vmem>>, vector<1x32x128xf32>
    %1 = vector.shape_cast %0 : vector<1x32x128xf32> to vector<32x128xf32>
    %c0_2 = arith.constant 0 : index
    %c0_3 = arith.constant 0 : index
    %2 = vector.load %arg4[%c0_2, %c0_3] : memref<64x32xf32, #tpu.memory_space<vmem>>, vector<64x32xf32>
    %cst = arith.constant dense<0.000000e+00> : vector<64x128xf32>
    %3 = tpu.matmul %2, %1, %cst {dimension_numbers = #tpu.dot_dimension_numbers<[1], [0], [0], [1], [0, 0, 1, 1], [], []>} : vector<64x32xf32>, vector<32x128xf32>, vector<64x128xf32> -> vector<64x128xf32>
    %c0_4 = arith.constant 0 : index
    %c0_5 = arith.constant 0 : index
    %4 = vector.load %arg5[%c0_4, %c0_5] : memref<64x1xf32, #tpu.memory_space<vmem>>, vector<64x1xf32>
    %5 = vector.broadcast %4 : vector<64x1xf32> to vector<64x128xf32>
    %6 = arith.addf %3, %5 : vector<64x128xf32>
    %cst_6 = arith.constant 0.000000e+00 : f32
    %7 = vector.broadcast %cst_6 : f32 to vector<64x128xf32>
    %cst_7 = arith.constant 0.000000e+00 : f32
    %8 = vector.broadcast %cst_7 : f32 to vector<64x128xf32>
    %c0_8 = arith.constant 0 : index
    %c0_9 = arith.constant 0 : index
    %9 = vector.load %arg10[%c0_8, %c0_9] : memref<64x384xf32, #tpu.memory_space<vmem>>, vector<64x128xf32>
    tpu.vector_store %arg10[%c0_8, %c0_9], %7 {strides = array<i32>} : memref<64x384xf32, #tpu.memory_space<vmem>>, vector<64x128xf32>,
    %c0_10 = arith.constant 0 : index
    %c128 = arith.constant 128 : index
    %10 = vector.load %arg10[%c0_10, %c128] : memref<64x384xf32, #tpu.memory_space<vmem>>, vector<64x128xf32>
    tpu.vector_store %arg10[%c0_10, %c128], %6 {strides = array<i32>} : memref<64x384xf32, #tpu.memory_space<vmem>>, vector<64x128xf32>,
    %c0_11 = arith.constant 0 : index
    %c256 = arith.constant 256 : index
    %11 = vector.load %arg10[%c0_11, %c256] : memref<64x384xf32, #tpu.memory_space<vmem>>, vector<64x128xf32>
    tpu.vector_store %arg10[%c0_11, %c256], %8 {strides = array<i32>} : memref<64x384xf32, #tpu.memory_space<vmem>>, vector<64x128xf32>,
    %c0_12 = arith.constant 0 : index
    %c0_13 = arith.constant 0 : index
    %12 = vector.load %arg6[%c0_12, %c0_13] : memref<64x5xf32, #tpu.memory_space<vmem>>, vector<64x5xf32>
    %c0_14 = arith.constant 0 : index
    %c126 = arith.constant 126 : index
    %13 = vector.load %arg10[%c0_14, %c126] : memref<64x384xf32, #tpu.memory_space<vmem>>, vector<64x128xf32>
    %14 = vector.extract_strided_slice %12 {offsets = [0, 0], sizes = [64, 1], strides = [1, 1]} : vector<64x5xf32> to vector<64x1xf32>
    %15 = vector.broadcast %14 : vector<64x1xf32> to vector<64x128xf32>
    %16 = arith.mulf %15, %13 : vector<64x128xf32>
    %c0_15 = arith.constant 0 : index
    %c127 = arith.constant 127 : index
    %17 = vector.load %arg10[%c0_15, %c127] : memref<64x384xf32, #tpu.memory_space<vmem>>, vector<64x128xf32>
    %18 = vector.extract_strided_slice %12 {offsets = [0, 1], sizes = [64, 1], strides = [1, 1]} : vector<64x5xf32> to vector<64x1xf32>
    %19 = vector.broadcast %18 : vector<64x1xf32> to vector<64x128xf32>
    %20 = arith.mulf %19, %17 : vector<64x128xf32>
    %21 = arith.addf %16, %20 : vector<64x128xf32>
    %c0_16 = arith.constant 0 : index
    %c128_17 = arith.constant 128 : index
    %22 = vector.load %arg10[%c0_16, %c128_17] : memref<64x384xf32, #tpu.memory_space<vmem>>, vector<64x128xf32>
    %23 = vector.extract_strided_slice %12 {offsets = [0, 2], sizes = [64, 1], strides = [1, 1]} : vector<64x5xf32> to vector<64x1xf32>
    %24 = vector.broadcast %23 : vector<64x1xf32> to vector<64x128xf32>
    %25 = arith.mulf %24, %22 : vector<64x128xf32>
    %26 = arith.addf %21, %25 : vector<64x128xf32>
    %c0_18 = arith.constant 0 : index
    %c129 = arith.constant 129 : index
    %27 = vector.load %arg10[%c0_18, %c129] : memref<64x384xf32, #tpu.memory_space<vmem>>, vector<64x128xf32>
    %28 = vector.extract_strided_slice %12 {offsets = [0, 3], sizes = [64, 1], strides = [1, 1]} : vector<64x5xf32> to vector<64x1xf32>
    %29 = vector.broadcast %28 : vector<64x1xf32> to vector<64x128xf32>
    %30 = arith.mulf %29, %27 : vector<64x128xf32>
    %31 = arith.addf %26, %30 : vector<64x128xf32>
    %c0_19 = arith.constant 0 : index
    %c130 = arith.constant 130 : index
    %32 = vector.load %arg10[%c0_19, %c130] : memref<64x384xf32, #tpu.memory_space<vmem>>, vector<64x128xf32>
    %33 = vector.extract_strided_slice %12 {offsets = [0, 4], sizes = [64, 1], strides = [1, 1]} : vector<64x5xf32> to vector<64x1xf32>
    %34 = vector.broadcast %33 : vector<64x1xf32> to vector<64x128xf32>
    %35 = arith.mulf %34, %32 : vector<64x128xf32>
    %36 = arith.addf %31, %35 : vector<64x128xf32>
    %c0_20 = arith.constant 0 : index
    %c0_21 = arith.constant 0 : index
    %37 = vector.load %arg7[%c0_20, %c0_21] : memref<32x64xf32, #tpu.memory_space<vmem>>, vector<32x64xf32>
    %cst_22 = arith.constant dense<0.000000e+00> : vector<32x128xf32>
    %38 = tpu.matmul %37, %36, %cst_22 {dimension_numbers = #tpu.dot_dimension_numbers<[1], [0], [0], [1], [0, 0, 1, 1], [], []>} : vector<32x64xf32>, vector<64x128xf32>, vector<32x128xf32> -> vector<32x128xf32>
    %c0_23 = arith.constant 0 : index
    %c0_24 = arith.constant 0 : index
    %39 = vector.load %arg8[%c0_23, %c0_24] : memref<32x1xf32, #tpu.memory_space<vmem>>, vector<32x1xf32>
    %40 = vector.broadcast %39 : vector<32x1xf32> to vector<32x128xf32>
    %41 = arith.addf %38, %40 : vector<32x128xf32>
    %c0_25 = arith.constant 0 : index
    %c0_26 = arith.constant 0 : index
    %c0_27 = arith.constant 0 : index
    %42 = vector.load %arg9[%c0_25, %c0_26, %c0_27] : memref<1x32x128xf32, #tpu.memory_space<vmem>>, vector<1x32x128xf32>
    %43 = vector.shape_cast %42 : vector<1x32x128xf32> to vector<32x128xf32>
    %44 = vector.shape_cast %41 : vector<32x128xf32> to vector<1x32x128xf32>
    tpu.vector_store %arg9[%c0_25, %c0_26, %c0_27], %44 {strides = array<i32>} : memref<1x32x128xf32, #tpu.memory_space<vmem>>, vector<1x32x128xf32>,
    return
  }
  func.func @transform_0(%arg0: i32, %arg1: i32) -> (i32, i32, i32) {
    %c0_i32 = arith.constant 0 : i32
    %c0_i32_0 = arith.constant 0 : i32
    return %arg0, %c0_i32, %arg1 : i32, i32, i32
  }
  func.func @transform_1(%arg0: i32, %arg1: i32) -> (i32, i32, i32, i32) {
    %c0_i32 = arith.constant 0 : i32
    %c0_i32_0 = arith.constant 0 : i32
    %c0_i32_1 = arith.constant 0 : i32
    return %arg0, %arg1, %c0_i32, %c0_i32_0 : i32, i32, i32, i32
  }
  func.func @transform_2(%arg0: i32, %arg1: i32) -> (i32, i32) {
    %c0_i32 = arith.constant 0 : i32
    %c0_i32_0 = arith.constant 0 : i32
    %c0_i32_1 = arith.constant 0 : i32
    return %c0_i32, %c0_i32_0 : i32, i32
  }
  func.func @transform_3(%arg0: i32, %arg1: i32) -> (i32, i32) {
    %c0_i32 = arith.constant 0 : i32
    %c0_i32_0 = arith.constant 0 : i32
    %c0_i32_1 = arith.constant 0 : i32
    return %c0_i32, %c0_i32_0 : i32, i32
  }
  func.func @transform_4(%arg0: i32, %arg1: i32) -> (i32, i32) {
    %c0_i32 = arith.constant 0 : i32
    %c0_i32_0 = arith.constant 0 : i32
    %c0_i32_1 = arith.constant 0 : i32
    return %c0_i32, %c0_i32_0 : i32, i32
  }
  func.func @transform_5(%arg0: i32, %arg1: i32) -> (i32, i32) {
    %c0_i32 = arith.constant 0 : i32
    %c0_i32_0 = arith.constant 0 : i32
    %c0_i32_1 = arith.constant 0 : i32
    return %c0_i32, %c0_i32_0 : i32, i32
  }
  func.func @transform_6(%arg0: i32, %arg1: i32) -> (i32, i32) {
    %c0_i32 = arith.constant 0 : i32
    %c0_i32_0 = arith.constant 0 : i32
    %c0_i32_1 = arith.constant 0 : i32
    return %c0_i32, %c0_i32_0 : i32, i32
  }
  func.func @transform_7(%arg0: i32, %arg1: i32) -> (i32, i32, i32) {
    %c0_i32 = arith.constant 0 : i32
    %c0_i32_0 = arith.constant 0 : i32
    return %arg0, %c0_i32, %arg1 : i32, i32, i32
  }
}

</mosaic_0001>

<bundles_post_ra>
// kernel: tile.16
= control target key start
LH: loop header
LB: loop body
LE: loop exit
PB: predicated region body
PF: predicated region fallthrough
CT: control target
= control target key end

     0   :  { %s28_s0 = inlined_call_operand.vmem [shape: f32[4], index: 0, kind: input, shape index: {}]   ;;  %s29_s1 = inlined_call_operand.vmem [shape: f32[16,4], index: 1, kind: output, shape index: {}]  }
   0x1   :  { %v4_v0 = vld [vmem:[%s28_s0] ss:$0 sm:$0xff] }
   0x2   :  { %5 = vst [vmem:[%s29_s1] sm:$0xff] %v4_v0 }
   0x3   :  { %8 = vst [vmem:[%s29_s1 + $0x8] sm:$0xff] %v4_v0 }

// kernel: tile.17
= control target key start
LH: loop header
LB: loop body
LE: loop exit
PB: predicated region body
PF: predicated region fallthrough
CT: control target
= control target key end

     0   :  { %s131_s10 = smov 60   ;;  %s132_s11 = smov 52   ;;  %vm3_vm0 = vcmask 31744   ;;  %vm9_vm1 = vcmask 523744   ;;  %vm15_vm2 = vcmask 490944   ;;  %vm21_vm3 = vcmask 458144   ;;  %s207_s0 = inlined_call_operand.vmem [shape: f32[16,4], index: 0, kind: input, shape index: {}]   ;;  %s208_s1 = inlined_call_operand.vmem [shape: f32[64], index: 1, kind: output, shape index: {}]  }
   0x1   :  { %v101_v0 = vld [vmem:[%s207_s0 + $0xf] sm:$0x1]   ;;  %v103_v1 = vld [vmem:[%s207_s0 + $0xd] sm:$0x1]   ;;  %v105_v2 = vld [vmem:[%s207_s0 + $0xb] sm:$0x1]  }
   0x2   :  { %7 = vrot.lane.b32.xlu0 %v101_v0, %s131_s10  ;;  %19 = vrot.lane.b32.xlu1 %v103_v1, %s132_s11  ;;  %s133_s14 = smov 44   ;;  %v102_v3 = vld [vmem:[%s207_s0 + $0xe] sm:$0x1]   ;;  %v104_v4 = vld [vmem:[%s207_s0 + $0xc] sm:$0x1]   ;;  %s134_s19 = smov 56  }
   0x3   :  { %31 = vrot.lane.b32.xlu2 %v105_v2, %s133_s14  ;;  %s135_s20 = smov 48   ;;  %v106_v5 = vld [vmem:[%s207_s0 + $0xa] sm:$0x1]   ;;  %s136_s23 = smov 40   ;;  %v107_v6 = vld [vmem:[%s207_s0 + $0x9] sm:$0x1]  }
   0x4   :  { %v108_v7 = vld [vmem:[%s207_s0 + $0x8] sm:$0x1]   ;;  %s137_s28 = smov 36   ;;  %s138_s29 = smov 32   ;;  %v109_v8 = vld [vmem:[%s207_s0 + $0x7] sm:$0x1]  }
   0x5   :  { %s139_s3 = smov 28   ;;  %v110_v9 = vld [vmem:[%s207_s0 + $0x6] sm:$0x1]   ;;  %v111_v10 = vld [vmem:[%s207_s0 + $0x5] sm:$0x1]   ;;  %s140_s8 = smov 24  }
   0x6   :  { %s141_s9 = smov 20   ;;  %v112_v11 = vld [vmem:[%s207_s0 + $0x4] sm:$0x1]   ;;  %s142_s12 = smov 16   ;;  %v113_v12 = vld [vmem:[%s207_s0 + $0x3] sm:$0x1]  }
   0x7   :  { %v114_v13 = vld [vmem:[%s207_s0 + $0x2] sm:$0x1]   ;;  %s143_s17 = smov 12   ;;  %s144_s18 = smov 8   ;;  %v115_v14 = vld [vmem:[%s207_s0 + $0x1] sm:$0x1]  }
   0x8   :  { %s145_s21 = smov 4   ;;  %v2_v15 = vld [vmem:[%s207_s0] sm:$0x1]   ;;  %vm27_vm4 = vcmask 425344   ;;  %vm33_vm5 = vcmask 392544   ;;  %vm39_vm6 = vcmask 359744  }
   0x9   :  { %4 = vst.msk [vmem:[#allocation0] sm:$0x1] %vm3_vm0, %v2_v15   ;;  %vm45_vm7 = vcmask 326944   ;;  %vm51_vm8 = vcmask 294144   ;;  %vm57_vm9 = vcmask 261344   ;;  %vm63_vm10 = vcmask 228544  }
   0xa   :  { %13 = vrot.lane.b32.xlu0 %v102_v3, %s134_s19  ;;  %25 = vrot.lane.b32.xlu1 %v104_v4, %s135_s20  ;;  %vm69_vm11 = vcmask 195744   ;;  %vm75_vm12 = vcmask 162944   ;;  %vm81_vm13 = vcmask 130144   ;;  %vm87_vm14 = vcmask 97344  }
   0xb   :  { %37 = vrot.lane.b32.xlu2 %v106_v5, %s136_s23  ;;  %vm93_vm15 = vcmask 64544  }
  0x12   :  { %43 = vrot.lane.b32.xlu0 %v107_v6, %s137_s28  ;;  %49 = vrot.lane.b32.xlu1 %v108_v7, %s138_s29 }
  0x13   :  { %55 = vrot.lane.b32.xlu2 %v109_v8, %s139_s3 }
  0x1a   :  { %61 = vrot.lane.b32.xlu0 %v110_v9, %s140_s8  ;;  %67 = vrot.lane.b32.xlu1 %v111_v10, %s141_s9 }
  0x1b   :  { %73 = vrot.lane.b32.xlu2 %v112_v11, %s142_s12 }
  0x22   :  { %79 = vrot.lane.b32.xlu0 %v113_v12, %s143_s17  ;;  %85 = vrot.lane.b32.xlu1 %v114_v13, %s144_s18 }
  0x23   :  { %91 = vrot.lane.b32.xlu2 %v115_v14, %s145_s21 }
  0x5d   :  { %v32_v16 = vpop.permute.xlu2 %31  }
  0x65   :  { %v38_v17 = vpop.permute.xlu2 %37  }
  0x6d   :  { %v56_v18 = vpop.permute.xlu2 %55  }
  0x74   :  { %v8_v19 = vpop.permute.xlu0 %7   ;;  %v20_v20 = vpop.permute.xlu1 %19  }
  0x75   :  { %10 = vst.msk [vmem:[#allocation0] sm:$0x1] %vm9_vm1, %v8_v19   ;;  %v74_v21 = vpop.permute.xlu2 %73  }
  0x7c   :  { %v14_v22 = vpop.permute.xlu0 %13   ;;  %v26_v23 = vpop.permute.xlu1 %25  }
  0x7d   :  { %16 = vst.msk [vmem:[#allocation0] sm:$0x1] %vm15_vm2, %v14_v22   ;;  %v92_v24 = vpop.permute.xlu2 %91  }
  0x7e   :  { %22 = vst.msk [vmem:[#allocation0] sm:$0x1] %vm21_vm3, %v20_v20  }
  0x7f   :  { %28 = vst.msk [vmem:[#allocation0] sm:$0x1] %vm27_vm4, %v26_v23  }
  0x80   :  { %34 = vst.msk [vmem:[#allocation0] sm:$0x1] %vm33_vm5, %v32_v16  }
  0x81   :  { %40 = vst.msk [vmem:[#allocation0] sm:$0x1] %vm39_vm6, %v38_v17  }
  0x84   :  { %v44_v25 = vpop.permute.xlu0 %43   ;;  %v50_v26 = vpop.permute.xlu1 %49  }
  0x85   :  { %46 = vst.msk [vmem:[#allocation0] sm:$0x1] %vm45_vm7, %v44_v25  }
  0x86   :  { %52 = vst.msk [vmem:[#allocation0] sm:$0x1] %vm51_vm8, %v50_v26  }
  0x87   :  { %58 = vst.msk [vmem:[#allocation0] sm:$0x1] %vm57_vm9, %v56_v18  }
  0x8c   :  { %v62_v27 = vpop.permute.xlu0 %61   ;;  %v68_v28 = vpop.permute.xlu1 %67  }
  0x8d   :  { %64 = vst.msk [vmem:[#allocation0] sm:$0x1] %vm63_vm10, %v62_v27  }
  0x8e   :  { %70 = vst.msk [vmem:[#allocation0] sm:$0x1] %vm69_vm11, %v68_v28  }
  0x8f   :  { %76 = vst.msk [vmem:[#allocation0] sm:$0x1] %vm75_vm12, %v74_v21  }
  0x94   :  { %v80_v29 = vpop.permute.xlu0 %79   ;;  %v86_v30 = vpop.permute.xlu1 %85  }
  0x95   :  { %82 = vst.msk [vmem:[#allocation0] sm:$0x1] %vm81_vm13, %v80_v29  }
  0x96   :  { %88 = vst.msk [vmem:[#allocation0] sm:$0x1] %vm87_vm14, %v86_v30  }
  0x97   :  { %94 = vst.msk [vmem:[#allocation0] sm:$0x1] %vm93_vm15, %v92_v24  }
  0x9e   :  { %v97_v31 = vld [vmem:[#allocation0] sm:$0x1] }
  0x9f   :  { %100 = vst [vmem:[%s208_s1] sm:$0x1] %v97_v31 }

// kernel: focus_forward.1
= control target key start
LH: loop header
LB: loop body
LE: loop exit
PB: predicated region body
PF: predicated region fallthrough
CT: control target
= control target key end

     0   :  { %12 = vsyncpa [#allocation4], 0  ;;  %s2203_s0 = inlined_call_operand.vmem [shape: f32[2,32,128], index: 0, kind: input, shape index: {}]   ;;  %s2204_s1 = inlined_call_operand.vmem [shape: f32[2,1,32,4], index: 1, kind: input, shape index: {}]   ;;  %s2205_s2 = inlined_call_operand.vmem [shape: f32[64,32], index: 2, kind: input, shape index: {}]   ;;  %s2206_s3 = inlined_call_operand.vmem [shape: f32[64,1], index: 3, kind: input, shape index: {}]   ;;  %s2207_s4 = inlined_call_operand.vmem [shape: f32[64,5], index: 4, kind: input, shape index: {}]   ;;  %s2208_s5 = inlined_call_operand.vmem [shape: f32[32,64], index: 5, kind: input, shape index: {}]   ;;  %s2209_s6 = inlined_call_operand.vmem [shape: f32[32,1], index: 6, kind: input, shape index: {}]   ;;  %s2210_s7 = inlined_call_operand.hbm [shape: f32[2,32,128], index: 7, kind: output, shape index: {}]  }
   0x1   :  { %14 = vsyncpa [#allocation4 + $0x1], 0  ;;  %s1635_s1 = smov 0   ;;  %s1637_s24 = smov 0  }
   0x2   :  { %s1639_s25 = smov 0   ;;  %s1641_s26 = smov 0  }
   0x3   :  { %s1643_s27 = smov 0   ;;  %s1645_s28 = smov 0  }
   0x4 LB: > { %s1336_s29 = sadd.s32 4294967295, %s1581_s28   ;;  %s1337_s30 = sadd.s32 4294967294, %s1581_s28   ;;  %s1581_s28 = sphi %s1645_s28, %s20_s28   ;;  %s1577_s27 = sphi %s1643_s27, %s2217_s27   ;;  %s1573_s26 = sphi %s1641_s26, %s2216_s26   ;;  %s1569_s25 = sphi %s1639_s25, %s2215_s25   ;;  %s1565_s24 = sphi %s1637_s24, %s2214_s24   ;;  %s1561_s1 = sphi %s1635_s1, %s2213_s1  }
   0x5   : > { %s32_s8 = sadd.s32 1, %s1577_s27  ;;  %s202_s9 = sadd.s32 1, %s1569_s25 }
   0x6   : > { %p34_p0 = scmp.ge.s32.totalorder %s32_s8, 2  ;;  %p212_p1 = scmp.ne.s32.totalorder %s1569_s25, %s1565_s24 }
   0x7   : > { %p213_p2 = scmp.eq.s32.totalorder %s1336_s29, 1  ;;  %p218_p3 = scmp.ne.s32.totalorder %s1565_s24, %s1561_s1 }
   0x8   : > { %s2219_s8 = smov (%p34_p0, %s32_s8), 0  ;;  %p219_p5 = scmp.eq.s32.totalorder %s1337_s30, 1 }
   0x9   : > { %p1675_p4 = por %p213_p2, %p212_p1  ;;  %s197_s11 = ssub.s32 %s1577_s27, %s2219_s8 }
   0xa   : > { %p1340_p6 = scmp.ge.s32.totalorder %s1581_s28, 1  ;;  %p200_p7 = scmp.eq.s32.totalorder %s197_s11, 0 }
   0xb   : > { %p1682_p8 = por %p219_p5, %p218_p3  ;;  %p275_p9 = scmp.lt.s32.totalorder %s1581_s28, 3 }
   0xc   : > { %s1688_s13 = scalar_select %p200_p7, %s1569_s25, %s202_s9  }
   0xd   : > { %p276_p10 = pnand %p1340_p6, %p275_p9 }
   0xe   : > { %p319_p11 = scmp.lt.s32.totalorder (!%p276_p10), %s1573_s26, 1  ;;  %s1589_s9 = smov (!%p276_p10), 126  }
   0xf   : > { %279 = sbr.rel (%p276_p10) target bundleno = 870 (0x366), region = 48  ;;  %s1590_s11 = smov (!%p276_p10), 124  }
  0x10   : > { %s1591_s14 = smov (!%p276_p10), 125   ;;  %s1592_s15 = smov (!%p276_p10), 2  }
  0x11   : > { %s1523_s17 = scalar_lea.hbm (!%p276_p10), %s2210_s7, 64 }
  0x14   : > { %v352_v0 = vld [vmem:[%s2206_s3 + $0x20] sm:$0xff]  ;;  %v350_v1 = vld [vmem:[%s2206_s3 + $0x10] sm:$0xff]  ;;  %v1583_v2 = vmov 0   ;;  %s320_s18 = scalar_select %p319_p11, %s1573_s26, 1  ;;  %v353_v6 = vld [vmem:[%s2206_s3 + $0x28] sm:$0xff]  ;;  %vm396_vm0 = vcmask 261120  }
  0x15   : > { %1444 = vset.pattern.permute.xlu2 %v1583_v2  ;;  %1443 = vset.pattern.permute.xlu1 %v1583_v2  ;;  %v348_v3 = vld [vmem:[%s2206_s3] sm:$0xff]  ;;  %v351_v7 = vld [vmem:[%s2206_s3 + $0x18] sm:$0xff]  ;;  %v1584_v12 = vmov 1   ;;  %v1724_v13 = vld [vmem:[%s2207_s4 + $0x10] sm:$0xff]  ;;  %v1585_v25 = vmov 2   ;;  %v1586_v29 = vmov 4  }
  0x16   : > { %378 = vperm.xlu2 %1444, %v352_v0   ;;  %368 = vperm.xlu1 %1443, %v350_v1   ;;  %s1361_s21 = sshll.u32 %s320_s18, 5  ;;  %v340_v10 = vld [vmem:[%s2205_s2] sm:$0xff]  ;;  %v343_v11 = vld [vmem:[%s2205_s2 + $0x18] sm:$0xff]  ;;  %v341_v17 = vld [vmem:[%s2205_s2 + $0x8] sm:$0xff]  ;;  %v1587_v30 = vmov 3   ;;  %vm662_vm1 = vcmask 1039360  }
  0x17   : > { %1442 = vset.pattern.permute.xlu0 %v1583_v2  ;;  %s326_s29 = scalar_lea.vmem %s2203_s0, %s1361_s21  ;;  %v1729_v14 = vld [vmem:[%s2207_s4] sm:$0xff]  ;;  %v355_v15 = vld [vmem:[%s2206_s3 + $0x38] sm:$0xff]  ;;  %v345_v20 = vld [vmem:[%s2205_s2 + $0x28] sm:$0xff]  ;;  %s1588_s21 = smov 127   ;;  %vm1040_vm2 = vcmask 1014784   ;;  %vm903_vm3 = vcmask 1022976  }
  0x18   : > { %358 = vperm.xlu0 %1442, %v348_v3   ;;  %v339_v4 = vld [vmem:[%s326_s29 + $0x18] sm:$0xff]  ;;  %v338_v5 = vld [vmem:[%s326_s29 + $0x10] sm:$0xff]  ;;  %v337_v8 = vld [vmem:[%s326_s29 + $0x8] sm:$0xff]  ;;  %vm1157_vm4 = vcmask 15360   ;;  %vm1174_vm5 = vcmask 523264   ;;  %s316_s18 = sand.u32 1, %s1565_s24  }
  0x19   : > { %433 = vmatpush.msra.mxu0 %v339_v4  ;;  %1363 = vmatpush.msra.mxu2 %v339_v4  ;;  %v336_v9 = vld [vmem:[%s326_s29] sm:$0xff]  ;;  %v1745_v18 = vld [vmem:[%s2207_s4 + $0x38] sm:$0xff]  ;;  %v342_v21 = vld [vmem:[%s2205_s2 + $0x10] sm:$0xff]  ;;  %s1341_s19 = sshll.u32 %s316_s18, 5 }
  0x1a   : > { %v344_v16 = vld [vmem:[%s2205_s2 + $0x20] sm:$0xff]  ;;  %v1752_v19 = vld [vmem:[%s2207_s4 + $0x18] sm:$0xff]  ;;  %v1768_v22 = vld [vmem:[%s2207_s4 + $0x30] sm:$0xff]  ;;  %s318_s20 = scalar_lea.vmem [#allocation3], %s1341_s19 }
  0x1b   : > { %434 = vmatpush.msra.mxu0 %v338_v5  ;;  %1364 = vmatpush.msra.mxu2 %v338_v5  ;;  %v491_v23 = vld [vmem:[%s2207_s4 + $0x28] sm:$0xff]  ;;  %v346_v26 = vld [vmem:[%s2205_s2 + $0x30] sm:$0xff]  ;;  %v347_v27 = vld [vmem:[%s2205_s2 + $0x38] sm:$0xff]  ;;  %s1234_s30 = sshll.u32 %s318_s20, 4  ;;  %s1235_s30 = int_to_ptr.vmem [resolvable:$true] %s1234_s30 }
  0x1c   : > { %v1776_v24 = vld [vmem:[%s2207_s4 + $0x8] sm:$0xff]  ;;  %v1794_v28 = vld [vmem:[%s2207_s4 + $0x20] sm:$0xff]  ;;  %v354_v0 = vld [vmem:[%s2206_s3 + $0x30] sm:$0xff] }
  0x1d   : > { %435 = vmatpush.msra.mxu0 %v337_v8  ;;  %1365 = vmatpush.msra.mxu2 %v337_v8  ;;  %v349_v62 = vld [vmem:[%s2206_s3 + $0x8] sm:$0xff] }
  0x1e   : > { %383 = vperm.xlu2 %1444, %v353_v6   ;;  %373 = vperm.xlu1 %1443, %v351_v7  }
  0x1f   : > { %436 = vmatpush.msra.mxu0 %v336_v9  ;;  %1366 = vmatpush.msra.mxu2 %v336_v9 }
  0x20   : > { %1447 = vset.pattern.permute.xlu0 %v1584_v12  ;;  %1344 = vmatmul.msk.f32.vlgmr.msra.gmra.mxu0 %vm396_vm0, %v340_v10 }
  0x21   : > { %1347 = vmatmul.msk.f32.vlgmr.msra.gmra.mxu2 %vm396_vm0, %v343_v11  ;;  %575 = vperm.xlu0 %1447, %v1724_v13  }
  0x26   : > { %512 = vperm.xlu2 %1444, %v1729_v14   ;;  %393 = vperm.xlu1 %1443, %v355_v15  }
  0x28   : > { %1345 = vmatmul.msk.f32.gmra.mxu0 %vm396_vm0, %v341_v17 }
  0x29   : > { %1348 = vmatmul.msk.f32.gmra.mxu2 %vm396_vm0, %v344_v16  ;;  %595 = vperm.xlu0 %1447, %v1745_v18  }
  0x2e   : > { %527 = vperm.xlu2 %1444, %v1752_v19   ;;  %522 = vperm.xlu1 %1443, %v1724_v13  }
  0x30   : > { %1346 = vmatmul.msk.f32.gmra.mxu0 %vm396_vm0, %v342_v21 }
  0x31   : > { %1349 = vmatmul.msk.f32.gmra.mxu2 %vm396_vm0, %v345_v20  ;;  %1449 = vset.pattern.permute.xlu0 %v1585_v25 }
  0x32   : > { %708 = vperm.xlu0 %1449, %v1776_v24  }
  0x36   : > { %542 = vperm.xlu2 %1444, %v1768_v22   ;;  %537 = vperm.xlu1 %1443, %v491_v23  }
  0x39   : > { %1350 = vmatmul.msk.f32.gmra.mxu2 %vm396_vm0, %v346_v26 }
  0x3a   : > { %728 = vperm.xlu0 %1449, %v1768_v22  }
  0x3e   : > { %1446 = vset.pattern.permute.xlu2 %v1584_v12  ;;  %1445 = vset.pattern.permute.xlu1 %v1584_v12 }
  0x3f   : > { %571 = vperm.xlu2 %1446, %v1776_v24   ;;  %567 = vperm.xlu1 %1445, %v1729_v14  }
  0x41   : > { %1351 = vmatmul.msk.f32.gmra.mxu2 %vm396_vm0, %v347_v27 }
  0x42   : > { %1453 = vset.pattern.permute.xlu0 %v1586_v29 }
  0x47   : > { %583 = vperm.xlu2 %1446, %v1794_v28   ;;  %579 = vperm.xlu1 %1445, %v1752_v19  }
  0x4f   : > { %591 = vperm.xlu2 %1446, %v1768_v22   ;;  %587 = vperm.xlu1 %1445, %v491_v23  }
  0x57   : > { %1448 = vset.pattern.permute.xlu2 %v1585_v25  ;;  %1450 = vset.pattern.permute.xlu1 %v1585_v25 }
  0x58   : > { %704 = vperm.xlu2 %1448, %v1729_v14   ;;  %712 = vperm.xlu1 %1450, %v1724_v13  }
  0x60   : > { %716 = vperm.xlu2 %1448, %v1752_v19   ;;  %720 = vperm.xlu1 %1450, %v1794_v28  }
  0x68   : > { %724 = vperm.xlu2 %1448, %v491_v23   ;;  %732 = vperm.xlu1 %1450, %v1745_v18  }
  0x70   : > { %1451 = vset.pattern.permute.xlu2 %v1587_v30  ;;  %v379_v31 = vpop.permute.xlu2 %378  ;;  %1452 = vset.pattern.permute.xlu1 %v1586_v29 }
  0x71   : > { %836 = vperm.xlu2 %1451, %v1745_v18   ;;  %973 = vperm.xlu1 %1452, %v1745_v18  }
  0x78   : > { %v1809_v32 = vpop.permute.xlu2 %383 }
  0x79   : > { %828 = vperm.xlu2 %1451, %v491_v23  }
  0x80   : > { %v1811_v33 = vpop.permute.xlu2 %512 }
  0x88   : > { %v1813_v34 = vpop.permute.xlu2 %527  ;;  %v369_v35 = vpop.permute.xlu1 %368 }
  0x8a   : > { %v359_v36 = vpop.permute.xlu0 %358 }
  0x90   : > { %v1815_v37 = vpop.permute.xlu2 %542  ;;  %v374_v38 = vpop.permute.xlu1 %373 }
  0x93   : > { %v576_v39 = vpop.permute.xlu0 %575 }
  0x94   : > { %v602_v40 = vmul.f32 0.0, %v576_v39 }
  0x96   : > { %638 = vrot.lane.b32.xlu2 %v602_v40, %s1588_s21 }
  0x98   : > { %v1817_v41 = vpop.permute.xlu1 %393 }
  0x99   : > { %v1820_v42 = vpop.permute.xlu2 %571 }
  0x9a   : > { %v600_v43 = vmul.f32 0.0, %v1820_v42 }
  0x9b   : > { %v1837_v53 = vpop.permute.xlu0 %595 }
  0x9c   : > { %634 = vrot.lane.b32.xlu0 %v600_v43, %s1588_s21  ;;  %v612_v56 = vmul.f32 0.0, %v1837_v53 }
  0x9d   : > { %v438_v61 = vpop.f32.mrf.mxu0 }
  0x9e   : > { %v1863_v1 = vadd.f32 %v438_v61, %v359_v36 }
  0xa0   : > { %v1824_v44 = vpop.permute.xlu1 %522 }
  0xa1   : > { %v1826_v45 = vpop.permute.xlu2 %583 }
  0xa2   : > { %v606_v46 = vmul.f32 0.0, %v1826_v45 }
  0xa4   : > { %646 = vrot.lane.b32.xlu0 %v606_v46, %s1588_s21  ;;  %v447_v47 = vpop.f32.mrf.mxu2  ;;  %v551_v46 = vmul.f32 %v1811_v33, %v1863_v1 }
  0xa5   : > { %v1854_v63 = vpop.f32.mrf.mxu0  ;;  %v1869_v5 = vadd.f32 %v447_v47, %v374_v38  ;;  %v550_v47 = vmul.f32 0.0, %v1811_v33 }
  0xa8   : > { %v1830_v48 = vpop.permute.xlu1 %537 }
  0xa9   : > { %v1842_v57 = vpop.permute.xlu2 %591 }
  0xaa   : > { %v610_v59 = vmul.f32 0.0, %v1842_v57 }
  0xac   : > { %965 = vperm.xlu0 %1453, %v491_v23   ;;  %v450_v49 = vpop.f32.mrf.mxu2 }
  0xad   : > { %v1832_v50 = vadd.f32 %v450_v49, %v379_v31  ;;  %v444_v4 = vpop.f32.mrf.mxu0 }
  0xae   : > { %v1871_v6 = vadd.f32 %v444_v4, %v369_v35 }
  0xb0   : > { %v603_v8 = vmul.f32 %v576_v39, %v1871_v6 }
  0xb1   : > { %v568_v51 = vpop.permute.xlu1 %567 }
  0xb2   : > { %v598_v52 = vmul.f32 0.0, %v568_v51  ;;  %v599_v3 = vmul.f32 %v568_v51, %v1863_v1  ;;  %v1877_v9 = vpop.permute.xlu2 %704 }
  0xb4   : > { %630 = vrot.lane.b32.xlu1 %v598_v52, %s1588_s21  ;;  %1454 = vset.pattern.permute.xlu0 %v1587_v30  ;;  %v453_v10 = vpop.f32.mrf.mxu2 }
  0xb5   : > { %832 = vperm.xlu0 %1454, %v1768_v22   ;;  %v1881_v11 = vadd.f32 %v453_v10, %v1809_v32  ;;  %v607_v10 = vmul.f32 %v1826_v45, %v1832_v50 }
  0xb9   : > { %v580_v54 = vpop.permute.xlu1 %579 }
  0xba   : > { %v604_v55 = vmul.f32 0.0, %v580_v54  ;;  %v605_v7 = vmul.f32 %v580_v54, %v1869_v5  ;;  %v1888_v16 = vpop.permute.xlu2 %716 }
  0xbc   : > { %642 = vrot.lane.b32.xlu1 %v604_v55, %s1588_s21  ;;  %v456_v17 = vpop.f32.mrf.mxu2 }
  0xbd   : > { %658 = vrot.lane.b32.xlu0 %v612_v56, %s1588_s21  ;;  %v557_v56 = vmul.f32 %v1813_v34, %v1869_v5 }
  0xc1   : > { %v588_v58 = vpop.permute.xlu1 %587 }
  0xc2   : > { %v608_v60 = vmul.f32 0.0, %v588_v58  ;;  %v609_v12 = vmul.f32 %v588_v58, %v1881_v11  ;;  %v1895_v21 = vpop.permute.xlu2 %724  ;;  %v556_v58 = vmul.f32 0.0, %v1813_v34 }
  0xc4   : > { %654 = vrot.lane.b32.xlu1 %v610_v59, %s1588_s21  ;;  %650 = vrot.lane.b32.xlu2 %v608_v60, %s1588_s21 }
  0xc5   : > { %812 = vperm.xlu0 %1454, %v1776_v24  }
  0xca   : > { %v1886_v15 = vpop.permute.xlu1 %712 }
  0xcb   : > { %v1904_v26 = vpop.permute.xlu2 %836 }
  0xcc   : > { %969 = vperm.xlu1 %1452, %v1768_v22   ;;  %824 = vperm.xlu2 %1451, %v1794_v28   ;;  %v1897_v22 = vpop.permute.xlu0 %708 }
  0xcd   : > { %1457 = vset.pattern.permute.xlu0 %v1583_v2 }
  0xce   : > { %363 = vperm.xlu0 %1457, %v349_v62  }
  0xd2   : > { %v1893_v20 = vpop.permute.xlu1 %720 }
  0xd4   : > { %1455 = vset.pattern.permute.xlu1 %v1587_v30  ;;  %1456 = vset.pattern.permute.xlu2 %v1586_v29 }
  0xd5   : > { %820 = vperm.xlu1 %1455, %v1752_v19   ;;  %961 = vperm.xlu2 %1456, %v1794_v28  }
  0xd6   : > { %388 = vperm.xlu0 %1457, %v354_v0  }
  0xda   : > { %v733_v25 = vpop.permute.xlu1 %732 }
  0xdd   : > { %816 = vperm.xlu1 %1455, %v1724_v13   ;;  %632 = vrot.lane.b32.xlu2 %v599_v3, %s1588_s21 }
  0xde   : > { %517 = vperm.xlu0 %1457, %v1776_v24  }
  0xe3   : > { %v1920_v39 = vpop.permute.xlu1 %973 }
  0xe5   : > { %644 = vrot.lane.b32.xlu2 %v605_v7, %s1588_s21  ;;  %1458 = vset.pattern.permute.xlu1 %v1586_v29 }
  0xe6   : > { %640 = vrot.lane.b32.xlu0 %v603_v8, %s1588_s21 }
  0xed   : > { %957 = vperm.xlu2 %1456, %v1752_v19   ;;  %v459_v19 = vpop.f32.mrf.mxu2 }
  0xee   : > { %652 = vrot.lane.b32.xlu0 %v609_v12, %s1588_s21  ;;  %v1902_v23 = vadd.f32 %v459_v19, %v1817_v41 }
  0xf0   : > { %v742_v27 = vmul.f32 %v733_v25, %v1902_v23 }
  0xf5   : > { %1459 = vset.pattern.permute.xlu2 %v1587_v30  ;;  %v1908_v30 = vpop.permute.xlu2 %828 }
  0xf6   : > { %532 = vperm.xlu0 %1457, %v1794_v28   ;;  %808 = vperm.xlu2 %1459, %v1729_v14   ;;  %v729_v28 = vpop.permute.xlu0 %728 }
  0xfe   : > { %547 = vperm.xlu0 %1457, %v1745_v18   ;;  %1460 = vset.pattern.permute.xlu2 %v1586_v29  ;;  %v639_v18 = vpop.permute.xlu2 %638 }
 0x106   : > { %765 = vrot.lane.b32.xlu0 %v742_v27, %s1589_s9 }
 0x10e   : > { %v1910_v31 = vpop.permute.xlu0 %634 }
 0x116   : > { %v1912_v32 = vpop.permute.xlu0 %646 }
 0x11e   : > { %v651_v29 = vpop.permute.xlu2 %650  ;;  %v1914_v35 = vpop.permute.xlu0 %965 }
 0x126   : > { %v1916_v36 = vpop.permute.xlu2 %824  ;;  %v631_v43 = vpop.permute.xlu1 %630 }
 0x127   : > { %v1918_v38 = vpop.permute.xlu0 %832 }
 0x12e   : > { %v643_v59 = vpop.permute.xlu1 %642 }
 0x12f   : > { %v1922_v40 = vpop.permute.xlu2 %961  ;;  %v1924_v41 = vpop.permute.xlu0 %658 }
 0x136   : > { %v1966_v45 = vpop.permute.xlu1 %654 }
 0x137   : > { %v1929_v49 = vpop.permute.xlu0 %812  ;;  %v633_v51 = vpop.permute.xlu2 %632 }
 0x138   : > { %v663_v52 = vsel %vm662_vm1, %v631_v43, %v633_v51  ;;  %v1932_v54 = vadd.f32 %v633_v51, %v551_v46 }
 0x139   : > { %v1934_v55 = vadd.f32 %v663_v52, %v550_v47 }
 0x13f   : > { %v645_v60 = vpop.permute.xlu2 %644 }
 0x140   : > { %v666_v61 = vsel %vm662_vm1, %v643_v59, %v645_v60  ;;  %v1940_v62 = vadd.f32 %v645_v60, %v557_v56  ;;  %v364_v33 = vpop.permute.xlu0 %363  ;;  %v740_v59 = vmul.f32 %v1895_v21, %v1881_v11  ;;  %v991_v21 = vmul.f32 0.0, %v1920_v39 }
 0x141   : > { %v1942_v0 = vadd.f32 %v666_v61, %v556_v58  ;;  %v1945_v3 = vadd.f32 %v1854_v63, %v364_v33  ;;  %v990_v63 = vmul.f32 %v1920_v39, %v1902_v23  ;;  %v852_v58 = vmul.f32 0.0, %v1918_v38 }
 0x142   : > { %v984_v61 = vmul.f32 %v1922_v40, %v1832_v50  ;;  %v850_v33 = vmul.f32 0.0, %v1908_v30 }
 0x143   : > { %v601_v4 = vmul.f32 %v1820_v42, %v1945_v3 }
 0x145   : > { %636 = vrot.lane.b32.xlu1 %v601_v4, %s1588_s21 }
 0x148   : > { %v389_v7 = vpop.permute.xlu0 %388 }
 0x149   : > { %v1950_v8 = vadd.f32 %v456_v17, %v389_v7  ;;  %v554_v17 = vmul.f32 0.0, %v1824_v44  ;;  %v987_v7 = vmul.f32 0.0, %v1914_v35 }
 0x14b   : > { %v741_v34 = vmul.f32 %v729_v28, %v1950_v8  ;;  %v611_v12 = vmul.f32 %v1842_v57, %v1950_v8  ;;  %v555_v57 = vmul.f32 %v1824_v44, %v1871_v6  ;;  %v854_v28 = vmul.f32 0.0, %v1904_v26 }
 0x14c   : > { %v560_v44 = vmul.f32 0.0, %v1830_v48 }
 0x14d   : > { %763 = vrot.lane.b32.xlu0 %v741_v34, %s1589_s9  ;;  %648 = vrot.lane.b32.xlu1 %v607_v10, %s1588_s21  ;;  %v739_v10 = vmul.f32 %v1893_v20, %v1832_v50  ;;  %v735_v20 = vmul.f32 %v1877_v9, %v1863_v1 }
 0x14e   : > { %656 = vrot.lane.b32.xlu2 %v611_v12, %s1588_s21  ;;  %v842_v12 = vmul.f32 0.0, %v1929_v49 }
 0x150   : > { %v1960_v42 = vpop.permute.xlu0 %517 }
 0x155   : > { %1036 = vrot.lane.b32.xlu0 %v990_v63, %s1590_s11  ;;  %953 = vperm.xlu1 %1458, %v1724_v13   ;;  %v849_v13 = vmul.f32 %v1908_v30, %v1881_v11  ;;  %v986_v30 = vmul.f32 %v1914_v35, %v1881_v11  ;;  %v737_v63 = vmul.f32 %v1886_v15, %v1871_v6 }
 0x156   : > { %945 = vperm.xlu2 %1460, %v1729_v14   ;;  %v561_v14 = vmul.f32 %v1830_v48, %v1881_v11  ;;  %v848_v48 = vmul.f32 0.0, %v1916_v36  ;;  %v985_v11 = vmul.f32 0.0, %v1922_v40  ;;  %v841_v35 = vmul.f32 %v1929_v49, %v1945_v3 }
 0x157   : > { %v553_v40 = vmul.f32 %v1960_v42, %v1945_v3  ;;  %v552_v49 = vmul.f32 0.0, %v1960_v42 }
 0x158   : > { %v641_v19 = vpop.permute.xlu0 %640 }
 0x159   : > { %v665_v25 = vsel %vm662_vm1, %v639_v18, %v641_v19  ;;  %v1973_v27 = vadd.f32 %v641_v19, %v555_v57  ;;  %v970_v18 = vpop.permute.xlu1 %969 }
 0x15a   : > { %v1976_v43 = vadd.f32 %v665_v25, %v554_v17  ;;  %v989_v47 = vmul.f32 0.0, %v970_v18  ;;  %v988_v60 = vmul.f32 %v970_v18, %v1950_v8 }
 0x15d   : > { %891 = vrot.lane.b32.xlu0 %v849_v13, %s1591_s14  ;;  %949 = vperm.xlu1 %1458, %v1776_v24   ;;  %v613_v24 = vmul.f32 %v1837_v53, %v1902_v23  ;;  %v738_v53 = vmul.f32 %v1888_v16, %v1869_v5  ;;  %v847_v16 = vmul.f32 %v1916_v36, %v1832_v50  ;;  %v958_v36 = vpop.permute.xlu2 %957 }
 0x15e   : > { %901 = vrot.lane.b32.xlu2 %v854_v28, %s1591_s14  ;;  %v983_v39 = vmul.f32 0.0, %v958_v36  ;;  %v982_v17 = vmul.f32 %v958_v36, %v1869_v5  ;;  %v736_v28 = vmul.f32 %v1897_v22, %v1945_v3 }
 0x15f   : > { %1502 = vset.pattern.permute.xlu2 %v1583_v2 }
 0x160   : > { %v653_v46 = vpop.permute.xlu0 %652 }
 0x161   : > { %v668_v51 = vsel %vm662_vm1, %v651_v29, %v653_v46  ;;  %v1988_v52 = vadd.f32 %v653_v46, %v561_v14  ;;  %v853_v29 = vmul.f32 %v1904_v26, %v1902_v23  ;;  %v821_v26 = vpop.permute.xlu1 %820 }
 0x162   : > { %v1990_v56 = vadd.f32 %v668_v51, %v560_v44  ;;  %v846_v34 = vmul.f32 0.0, %v821_v26  ;;  %v845_v57 = vmul.f32 %v821_v26, %v1869_v5 }
 0x165   : > { %1034 = vrot.lane.b32.xlu0 %v989_v47, %s1590_s11  ;;  %660 = vrot.lane.b32.xlu1 %v613_v24, %s1588_s21  ;;  %v809_v19 = vpop.permute.xlu2 %808  ;;  %s1362_s21 = sshll.u32 %s1573_s26, 5 }
 0x166   : > { %897 = vrot.lane.b32.xlu2 %v852_v58, %s1591_s14  ;;  %1501 = vset.pattern.permute.xlu1 %v1583_v2  ;;  %v851_v2 = vmul.f32 %v1918_v38, %v1950_v8  ;;  %v840_v26 = vmul.f32 0.0, %v809_v19  ;;  %s1233_s29 = scalar_lea.hbm %s2210_s7, %s1362_s21 }
 0x168   : > { %v533_v15 = vpop.permute.xlu0 %532 }
 0x169   : > { %v817_v38 = vpop.permute.xlu1 %816  ;;  %v559_v22 = vmul.f32 %v533_v15, %v1832_v50  ;;  %v558_v51 = vmul.f32 0.0, %v533_v15 }
 0x16a   : > { %v843_v4 = vmul.f32 %v817_v38, %v1871_v6  ;;  %v844_v9 = vmul.f32 0.0, %v817_v38 }
 0x16d   : > { %889 = vrot.lane.b32.xlu0 %v848_v48, %s1591_s14  ;;  %899 = vrot.lane.b32.xlu1 %v853_v29, %s1591_s14 }
 0x16e   : > { %761 = vrot.lane.b32.xlu2 %v740_v59, %s1589_s9 }
 0x170   : > { %v548_v25 = vpop.permute.xlu0 %547 }
 0x175   : > { %757 = vrot.lane.b32.xlu0 %v738_v53, %s1589_s9  ;;  %895 = vrot.lane.b32.xlu1 %v851_v2, %s1591_s14 }
 0x176   : > { %1032 = vrot.lane.b32.xlu2 %v988_v60, %s1590_s11 }
 0x178   : > { %v2060_v13 = vpop.permute.xlu0 %765 }
 0x17d   : > { %1024 = vrot.lane.b32.xlu0 %v984_v61, %s1590_s11  ;;  %1038 = vrot.lane.b32.xlu1 %v991_v21, %s1590_s11 }
 0x17e   : > { %887 = vrot.lane.b32.xlu2 %v847_v16, %s1591_s14 }
 0x185   : > { %879 = vrot.lane.b32.xlu0 %v843_v4, %s1591_s14  ;;  %893 = vrot.lane.b32.xlu1 %v850_v33, %s1591_s14 }
 0x186   : > { %1030 = vrot.lane.b32.xlu2 %v987_v7, %s1590_s11 }
 0x18d   : > { %759 = vrot.lane.b32.xlu1 %v739_v10, %s1589_s9  ;;  %1022 = vrot.lane.b32.xlu0 %v983_v39, %s1590_s11  ;;  %v562_v10 = vmul.f32 0.0, %v1815_v37 }
 0x18e   : > { %885 = vrot.lane.b32.xlu2 %v846_v34, %s1591_s14 }
 0x195   : > { %1028 = vrot.lane.b32.xlu1 %v986_v30, %s1590_s11  ;;  %877 = vrot.lane.b32.xlu0 %v842_v12, %s1591_s14  ;;  %v563_v30 = vmul.f32 %v1815_v37, %v1950_v8 }
 0x196   : > { %755 = vrot.lane.b32.xlu2 %v737_v63, %s1589_s9  ;;  %v564_v63 = vmul.f32 0.0, %v548_v25 }
 0x19d   : > { %883 = vrot.lane.b32.xlu1 %v845_v57, %s1591_s14  ;;  %751 = vrot.lane.b32.xlu0 %v735_v20, %s1589_s9  ;;  %v565_v57 = vmul.f32 %v548_v25, %v1902_v23 }
 0x19e   : > { %1020 = vrot.lane.b32.xlu2 %v982_v17, %s1590_s11 }
 0x1a5   : > { %1026 = vrot.lane.b32.xlu1 %v985_v11, %s1590_s11 }
 0x1a6   : > { %875 = vrot.lane.b32.xlu2 %v841_v35, %s1591_s14 }
 0x1a8   : > { %v657_v5 = vpop.permute.xlu2 %656 }
 0x1a9   : > { %v669_v34 = vsel %vm662_vm1, %v1966_v45, %v657_v5  ;;  %v700_v20 = vadd.f32 %v657_v5, %v563_v30 }
 0x1aa   : > { %v699_v12 = vadd.f32 %v669_v34, %v562_v10 }
 0x1ad   : > { %881 = vrot.lane.b32.xlu1 %v844_v9, %s1591_s14 }
 0x1b0   : > { %v946_v14 = vpop.permute.xlu2 %945 }
 0x1b1   : > { %v977_v38 = vmul.f32 0.0, %v946_v14  ;;  %v976_v4 = vmul.f32 %v946_v14, %v1863_v1 }
 0x1b5   : > { %753 = vrot.lane.b32.xlu1 %v736_v28, %s1589_s9  ;;  %s1236_s9 = sshll.u32 %s1233_s29, 4  ;;  %s1237_s9 = int_to_ptr.hbm [resolvable:$true] %s1236_s9 }
 0x1b7   : > { %v637_v44 = vpop.permute.xlu1 %636 }
 0x1b8   : > { %v664_v18 = vsel %vm662_vm1, %v1910_v31, %v637_v44  ;;  %v2065_v46 = vadd.f32 %v637_v44, %v553_v40  ;;  %v902_v42 = vpop.permute.xlu2 %901 }
 0x1b9   : > { %v2067_v47 = vadd.f32 %v664_v18, %v552_v49 }
 0x1bf   : > { %v764_v24 = vpop.permute.xlu0 %763  ;;  %v649_v58 = vpop.permute.xlu1 %648 }
 0x1c0   : > { %v667_v48 = vsel %vm662_vm1, %v1912_v32, %v649_v58  ;;  %v2072_v29 = vadd.f32 %v649_v58, %v559_v22  ;;  %v898_v50 = vpop.permute.xlu2 %897  ;;  %v839_v32 = vmul.f32 %v809_v19, %v1863_v1  ;;  %v787_v17 = vadd.f32 %v764_v24, %v699_v12 }
 0x1c1   : > { %v2074_v59 = vadd.f32 %v667_v48, %v558_v51  ;;  %v788_v11 = vadd.f32 %v764_v24, %v700_v20 }
 0x1c7   : > { %v954_v53 = vpop.permute.xlu1 %953  ;;  %v1037_v60 = vpop.permute.xlu0 %1036 }
 0x1c8   : > { %v980_v31 = vmul.f32 %v954_v53, %v1871_v6  ;;  %v981_v2 = vmul.f32 0.0, %v954_v53  ;;  %v762_v6 = vpop.permute.xlu2 %761 }
 0x1ca   : > { %1016 = vrot.lane.b32.xlu1 %v980_v31, %s1590_s11  ;;  %1018 = vrot.lane.b32.xlu2 %v981_v2, %s1590_s11 }
 0x1cf   : > { %v950_v21 = vpop.permute.xlu1 %949  ;;  %v892_v16 = vpop.permute.xlu0 %891 }
 0x1d0   : > { %v978_v61 = vmul.f32 %v950_v21, %v1945_v3  ;;  %v979_v7 = vmul.f32 0.0, %v950_v21  ;;  %v1033_v36 = vpop.permute.xlu2 %1032 }
 0x1d2   : > { %1012 = vrot.lane.b32.xlu0 %v978_v61, %s1590_s11  ;;  %873 = vrot.lane.b32.xlu2 %v840_v26, %s1591_s14  ;;  %v785_v26 = vadd.f32 %v762_v6, %v1990_v56  ;;  %v786_v61 = vadd.f32 %v762_v6, %v1988_v52 }
 0x1d3   : > { %871 = vrot.lane.b32.xlu1 %v839_v32, %s1591_s14  ;;  %s1517_s14 = sshra.s32 %s1237_s9, 4  ;;  %s1518_s14 = int_to_ptr.hbm [resolvable:$true] %s1517_s14 }
 0x1d4   : > { %s1519_s26 = scalar_lea.hbm %s1518_s14, 32  ;;  %p1524_p1 = scmp.lt.s32.totalorder %s1518_s14, %s2210_s7 }
 0x1d5   : > { %p1520_p12 = scmp.ne.s32.totalorder %s1518_s14, %s1519_s26  ;;  %p1525_p2 = scmp.lt.s32.totalorder %s1523_s17, %s1519_s26 }
 0x1d7   : > { %v661_v33 = vpop.permute.xlu1 %660  ;;  %v1035_v3 = vpop.permute.xlu0 %1034  ;;  %p1521_p13 = pnand %p1520_p12, %p1675_p4  ;;  %p1526_p3 = por %p1525_p2, %p1524_p1 }
 0x1d8   : > { %v670_v1 = vsel %vm662_vm1, %v1924_v41, %v661_v33  ;;  %v702_v28 = vadd.f32 %v661_v33, %v565_v57  ;;  %v888_v37 = vpop.permute.xlu2 %887  ;;  %v1047_v40 = vsel %vm1040_vm2, %v1033_v36, %v1035_v3 }
 0x1d9   : > { %v701_v15 = vadd.f32 %v670_v1, %v564_v63  ;;  %p1522_p0 = pneg %p1521_p13 }
 0x1da   : > { %1010 = vrot.lane.b32.xlu0 %v977_v38, %s1590_s11  ;;  %1008 = vrot.lane.b32.xlu2 %v976_v4, %s1590_s11  ;;  %v790_v25 = vadd.f32 %v2060_v13, %v702_v28  ;;  %v938_v38 = vadd.f32 %v892_v16, %v785_v26 }
 0x1db   : > { %1014 = vrot.lane.b32.xlu1 %v979_v7, %s1590_s11  ;;  %v789_v5 = vadd.f32 %v2060_v13, %v701_v15  ;;  %s1221_s11 = scalar_lea.sflag [#allocation4], %s316_s18  ;;  %p1527_p5 = pnand %p1526_p3, %p1522_p0 }
 0x1df   : > { %v900_v39 = vpop.permute.xlu1 %899  ;;  %v890_v35 = vpop.permute.xlu0 %889 }
 0x1e0   : > { %v911_v23 = vsel %vm903_vm3, %v900_v39, %v902_v42  ;;  %v942_v14 = vadd.f32 %v900_v39, %v789_v5  ;;  %v1031_v53 = vpop.permute.xlu2 %1030 }
 0x1e1   : > { %v943_v18 = vadd.f32 %v911_v23, %v790_v25 }
 0x1e2   : > { %v1079_v24 = vadd.f32 %v1037_v60, %v942_v14 }
 0x1e7   : > { %v896_v45 = vpop.permute.xlu1 %895  ;;  %v758_v58 = vpop.permute.xlu0 %757 }
 0x1e8   : > { %v910_v19 = vsel %vm903_vm3, %v896_v45, %v898_v50  ;;  %v940_v9 = vadd.f32 %v896_v45, %v787_v17  ;;  %v886_v50 = vpop.permute.xlu2 %885  ;;  %v781_v34 = vadd.f32 %v758_v58, %v1942_v0  ;;  %v782_v56 = vadd.f32 %v758_v58, %v1940_v62 }
 0x1e9   : > { %v941_v8 = vadd.f32 %v910_v19, %v788_v11  ;;  %v908_v0 = vsel %vm903_vm3, %v888_v37, %v890_v35 }
 0x1ea   : > { %v1077_v41 = vadd.f32 %v1033_v36, %v940_v9 }
 0x1eb   : > { %v1078_v49 = vadd.f32 %v1047_v40, %v941_v8 }
 0x1ed   : > { %v1466_v44 = vpack.i.bf16 %v1078_v49, %v1077_v41 }
 0x1ef   : > { %v1039_v22 = vpop.permute.xlu1 %1038  ;;  %1467 = vrot.lane.b32.xlu2 %v1466_v44, %s1592_s15  ;;  %v1025_v42 = vpop.permute.xlu0 %1024 }
 0x1f0   : > { %v1048_v51 = vsel %vm1040_vm2, %v1037_v60, %v1039_v22  ;;  %v756_v33 = vpop.permute.xlu2 %755 }
 0x1f1   : > { %v1080_v48 = vadd.f32 %v1048_v51, %v943_v18  ;;  %v779_v49 = vadd.f32 %v756_v33, %v1976_v43  ;;  %v1085_v43 = vld [vmem:[%s2209_s6] sm:$0xff] }
 0x1f3   : > { %v1471_v31 = vpack.i.bf16 %v1080_v48, %v1079_v24 }
 0x1f5   : > { %1472 = vrot.lane.b32.xlu1 %v1471_v31, %s1592_s15 }
 0x1f7   : > { %v894_v2 = vpop.permute.xlu1 %893  ;;  %v880_v32 = vpop.permute.xlu0 %879 }
 0x1f8   : > { %v909_v21 = vsel %vm903_vm3, %v892_v16, %v894_v2  ;;  %v1021_v16 = vpop.permute.xlu2 %1020  ;;  %v932_v23 = vadd.f32 %v880_v32, %v779_v49 }
 0x1f9   : > { %v939_v60 = vadd.f32 %v909_v21, %v786_v61 }
 0x1ff   : > { %v760_v13 = vpop.permute.xlu1 %759  ;;  %v1023_v10 = vpop.permute.xlu0 %1022 }
 0x200   : > { %v783_v12 = vadd.f32 %v760_v13, %v2074_v59  ;;  %v1044_v63 = vsel %vm1040_vm2, %v1021_v16, %v1023_v10  ;;  %v784_v57 = vadd.f32 %v760_v13, %v2072_v29  ;;  %v876_v40 = vpop.permute.xlu2 %875 }
 0x202   : > { %v936_v11 = vadd.f32 %v888_v37, %v783_v12  ;;  %v937_v62 = vadd.f32 %v908_v0, %v784_v57  ;;  %v780_v37 = vadd.f32 %v756_v33, %v1973_v27 }
 0x204   : > { %v1073_v9 = vadd.f32 %v1025_v42, %v936_v11 }
 0x207   : > { %v1029_v4 = vpop.permute.xlu1 %1028  ;;  %v878_v41 = vpop.permute.xlu0 %877 }
 0x208   : > { %v1046_v7 = vsel %vm1040_vm2, %v1029_v4, %v1031_v53  ;;  %v1075_v3 = vadd.f32 %v1029_v4, %v938_v38  ;;  %v905_v26 = vsel %vm903_vm3, %v876_v40, %v878_v41  ;;  %v1087_v41 = vld [vmem:[%s2209_s6 + $0x10] sm:$0xff] }
 0x209   : > { %v1076_v36 = vadd.f32 %v1046_v7, %v939_v60 }
 0x20b   : > { %v1461_v39 = vpack.i.bf16 %v1076_v36, %v1075_v3 }
 0x20d   : > { %1462 = vrot.lane.b32.xlu0 %v1461_v39, %s1592_s15 }
 0x20f   : > { %v884_v30 = vpop.permute.xlu1 %883  ;;  %v752_v25 = vpop.permute.xlu0 %751 }
 0x210   : > { %v907_v52 = vsel %vm903_vm3, %v884_v30, %v886_v50  ;;  %v934_v6 = vadd.f32 %v884_v30, %v781_v34  ;;  %v775_v27 = vadd.f32 %v752_v25, %v1934_v55  ;;  %v776_v50 = vadd.f32 %v752_v25, %v1932_v54 }
 0x211   : > { %v935_v1 = vadd.f32 %v907_v52, %v782_v56 }
 0x212   : > { %v1071_v20 = vadd.f32 %v1021_v16, %v934_v6 }
 0x213   : > { %v1072_v17 = vadd.f32 %v1044_v63, %v935_v1 }
 0x215   : > { %v1481_v15 = vpack.i.bf16 %v1072_v17, %v1071_v20 }
 0x217   : > { %v1027_v45 = vpop.permute.xlu1 %1026  ;;  %1482 = vrot.lane.b32.xlu2 %v1481_v15, %s1592_s15 }
 0x218   : > { %v1045_v19 = vsel %vm1040_vm2, %v1025_v42, %v1027_v45 }
 0x219   : > { %v1074_v28 = vadd.f32 %v1045_v19, %v937_v62 }
 0x21b   : > { %v1476_v59 = vpack.i.bf16 %v1074_v28, %v1073_v9 }
 0x21d   : > { %1477 = vrot.lane.b32.xlu1 %v1476_v59, %s1592_s15 }
 0x21f   : > { %v882_v8 = vpop.permute.xlu1 %881 }
 0x220   : > { %v906_v35 = vsel %vm903_vm3, %v880_v32, %v882_v8 }
 0x221   : > { %v933_v14 = vadd.f32 %v906_v35, %v780_v37 }
 0x224   : > { %v1019_v5 = vpop.permute.xlu2 %1018 }
 0x227   : > { %v754_v29 = vpop.permute.xlu1 %753 }
 0x228   : > { %v777_v31 = vadd.f32 %v754_v29, %v2067_v47  ;;  %v778_v2 = vadd.f32 %v754_v29, %v2065_v46  ;;  %v1088_v29 = vld [vmem:[%s2209_s6 + $0x18] sm:$0xff] }
 0x22a   : > { %v931_v38 = vadd.f32 %v905_v26, %v778_v2  ;;  %v930_v33 = vadd.f32 %v876_v40, %v777_v31  ;;  %v1086_v40 = vld [vmem:[%s2209_s6 + $0x8] sm:$0xff] }
 0x22c   : > { %v874_v58 = vpop.permute.xlu2 %873 }
 0x234   : > { %v1009_v21 = vpop.permute.xlu2 %1008 }
 0x23c   : > { %v1017_v44 = vpop.permute.xlu1 %1016 }
 0x23d   : > { %v1043_v18 = vsel %vm1040_vm2, %v1017_v44, %v1019_v5  ;;  %v1069_v22 = vadd.f32 %v1017_v44, %v932_v23  ;;  %v1081_v44 = vld [vmem:[%s2208_s5] sm:$0xff] }
 0x23e   : > { %v1070_v51 = vadd.f32 %v1043_v18, %v933_v14  ;;  %v1082_v18 = vld [vmem:[%s2208_s5 + $0x8] sm:$0xff] }
 0x240   : > { %v1486_v24 = vpack.i.bf16 %v1070_v51, %v1069_v22  ;;  %v1083_v51 = vld [vmem:[%s2208_s5 + $0x10] sm:$0xff] }
 0x242   : > { %1487 = vrot.lane.b32.xlu0 %v1486_v24, %s1592_s15  ;;  %v1084_v24 = vld [vmem:[%s2208_s5 + $0x18] sm:$0xff] }
 0x244   : > { %v1013_v48 = vpop.permute.xlu0 %1012 }
 0x245   : > { %v872_v53 = vpop.permute.xlu1 %871  ;;  %v1067_v7 = vadd.f32 %v1013_v48, %v930_v33 }
 0x246   : > { %v904_v42 = vsel %vm903_vm3, %v872_v53, %v874_v58  ;;  %v928_v13 = vadd.f32 %v872_v53, %v775_v27 }
 0x247   : > { %v929_v61 = vadd.f32 %v904_v42, %v776_v50 }
 0x248   : > { %v1065_v4 = vadd.f32 %v1009_v21, %v928_v13 }
 0x249   : > { %v1468_v39 = vpop.permute.xlu2 %1467 }
 0x24a   : > { %1091 = vperm.xlu0 %1457, %v1085_v43   ;;  %v1470_v56 = vunpack.i.h.bf16 %v1468_v39  ;;  %v1469_v10 = vunpack.i.l.bf16 %v1468_v39 }
 0x24c   : > { %v1011_v32 = vpop.permute.xlu0 %1010  ;;  %v1164_v16 = vsel %vm1157_vm4, %v1469_v10, %v1470_v56 }
 0x24d   : > { %v1015_v60 = vpop.permute.xlu1 %1014  ;;  %v1041_v55 = vsel %vm1040_vm2, %v1009_v21, %v1011_v32 }
 0x24e   : > { %v1042_v47 = vsel %vm1040_vm2, %v1013_v48, %v1015_v60  ;;  %v1066_v46 = vadd.f32 %v1041_v55, %v929_v61 }
 0x24f   : > { %v1068_v3 = vadd.f32 %v1042_v47, %v931_v38 }
 0x250   : > { %v1496_v36 = vpack.i.bf16 %v1066_v46, %v1065_v4 }
 0x251   : > { %v1491_v54 = vpack.i.bf16 %v1068_v3, %v1067_v7 }
 0x252   : > { %1497 = vrot.lane.b32.xlu2 %v1496_v36, %s1592_s15 }
 0x253   : > { %1492 = vrot.lane.b32.xlu1 %v1491_v54, %s1592_s15 }
 0x25a   : > { %1101 = vperm.xlu2 %1502, %v1087_v41  }
 0x25b   : > { %1096 = vperm.xlu1 %1501, %v1086_v40  }
 0x263   : > { %1106 = vperm.xlu1 %1501, %v1088_v29  }
 0x267   : > { %v1473_v34 = vpop.permute.xlu1 %1472 }
 0x268   : > { %v1475_v30 = vunpack.i.h.bf16 %v1473_v34  ;;  %v1474_v52 = vunpack.i.l.bf16 %v1473_v34 }
 0x26a   : > { %v1165_v6 = vsel %vm1157_vm4, %v1474_v52, %v1475_v30 }
 0x26b   : > { %1195 = vmatpush.msra.mxu1 %v1165_v6  ;;  %1367 = vmatpush.msra.mxu3 %v1165_v6 }
 0x26d   : > { %1196 = vmatpush.msra.mxu1 %v1164_v16  ;;  %1368 = vmatpush.msra.mxu3 %v1164_v16 }
 0x271   : > { %v1483_v57 = vpop.permute.xlu2 %1482 }
 0x272   : > { %v1485_v11 = vunpack.i.h.bf16 %v1483_v57  ;;  %v1484_v15 = vunpack.i.l.bf16 %v1483_v57 }
 0x274   : > { %v1161_v19 = vsel %vm1157_vm4, %v1484_v15, %v1485_v11 }
 0x27f   : > { %v1463_v12 = vpop.permute.xlu0 %1462 }
 0x280   : > { %v1465_v1 = vunpack.i.h.bf16 %v1463_v12  ;;  %v1464_v63 = vunpack.i.l.bf16 %v1463_v12 }
 0x282   : > { %v1163_v20 = vsel %vm1157_vm4, %v1464_v63, %v1465_v1 }
 0x283   : > { %1197 = vmatpush.msra.mxu1 %v1163_v20  ;;  %1369 = vmatpush.msra.mxu3 %v1163_v20 }
 0x28f   : > { %v1478_v17 = vpop.permute.xlu1 %1477 }
 0x290   : > { %v1480_v0 = vunpack.i.h.bf16 %v1478_v17  ;;  %v1479_v62 = vunpack.i.l.bf16 %v1478_v17 }
 0x292   : > { %v1162_v45 = vsel %vm1157_vm4, %v1479_v62, %v1480_v0 }
 0x293   : > { %1198 = vmatpush.msra.mxu1 %v1162_v45  ;;  %1370 = vmatpush.msra.mxu3 %v1162_v45 }
 0x295   : > { %1199 = vmatpush.msra.mxu1 %v1161_v19  ;;  %1371 = vmatpush.msra.mxu3 %v1161_v19 }
 0x2ac   : > { %v1498_v5 = vpop.permute.xlu2 %1497 }
 0x2ad   : > { %v1500_v35 = vunpack.i.h.bf16 %v1498_v5  ;;  %v1499_v37 = vunpack.i.l.bf16 %v1498_v5 }
 0x2af   : > { %v1158_v22 = vsel %vm1157_vm4, %v1499_v37, %v1500_v35 }
 0x2b4   : > { %v1488_v9 = vpop.permute.xlu0 %1487  ;;  %v1102_v2 = vpop.permute.xlu2 %1101 }
 0x2b5   : > { %v1490_v28 = vunpack.i.h.bf16 %v1488_v9  ;;  %v1489_v59 = vunpack.i.l.bf16 %v1488_v9 }
 0x2b7   : > { %v1160_v8 = vsel %vm1157_vm4, %v1489_v59, %v1490_v28 }
 0x2b8   : > { %1200 = vmatpush.msra.mxu1 %v1160_v8  ;;  %1372 = vmatpush.msra.mxu3 %v1160_v8 }
 0x2bc   : > { %v1092_v58 = vpop.permute.xlu0 %1091 }
 0x2c5   : > { %v1493_v49 = vpop.permute.xlu1 %1492 }
 0x2c6   : > { %v1495_v23 = vunpack.i.h.bf16 %v1493_v49  ;;  %v1494_v25 = vunpack.i.l.bf16 %v1493_v49 }
 0x2c8   : > { %v1159_v14 = vsel %vm1157_vm4, %v1494_v25, %v1495_v23 }
 0x2c9   : > { %1201 = vmatpush.msra.mxu1 %v1159_v14  ;;  %1373 = vmatpush.msra.mxu3 %v1159_v14 }
 0x2cb   : > { %1202 = vmatpush.msra.mxu1 %v1158_v22  ;;  %1374 = vmatpush.msra.mxu3 %v1158_v22 }
 0x2cc   : > { %1352 = vmatmul.msk.f32.vlgmr.msra.gmra.mxu1 %vm1174_vm5, %v1081_v44  ;;  %1353 = vmatmul.msk.f32.vlgmr.msra.gmra.mxu3 %vm1174_vm5, %v1082_v18 }
 0x2cd   : > { %v1097_v43 = vpop.permute.xlu1 %1096 }
 0x2d4   : > { %1354 = vmatmul.msk.f32.gmra.mxu3 %vm1174_vm5, %v1083_v51 }
 0x2d5   : > { %v1107_v13 = vpop.permute.xlu1 %1106 }
 0x2dc   : > { %1355 = vmatmul.msk.f32.gmra.mxu3 %vm1174_vm5, %v1084_v24 }
 0x349   : > { %v1204_v48 = vpop.f32.mrf.mxu1 }
 0x34a   : > { %v1205_v53 = vadd.f32 %v1204_v48, %v1092_v58 }
 0x34c   : > { %1216 = vst [vmem:[%s318_s20] sm:$0xff] %v1205_v53 }
 0x34f   : > { %v1207_v27 = vpop.f32.mrf.mxu3 }
 0x350   : > { %v1208_v31 = vadd.f32 %v1207_v27, %v1097_v43 }
 0x352   : > { %1217 = vst [vmem:[%s318_s20 + $0x8] sm:$0xff] %v1208_v31 }
 0x357   : > { %v1210_v42 = vpop.f32.mrf.mxu3 }
 0x358   : > { %v1211_v50 = vadd.f32 %v1210_v42, %v1102_v2 }
 0x35a   : > { %1218 = vst [vmem:[%s318_s20 + $0x10] sm:$0xff] %v1211_v50 }
 0x35f   : > { %v1213_v26 = vpop.f32.mrf.mxu3 }
 0x360   : > { %v1214_v21 = vadd.f32 %v1213_v26, %v1107_v13 }
 0x362   : > { %1219 = vst [vmem:[%s318_s20 + $0x18] sm:$0xff] %v1214_v21 }
 0x363   : > { %1530 = shalt.err (!%p1527_p5)
}
 0x364   : > { %s1593_s18 = smov 128   ;;  %s1594_s20 = smov 8  }
 0x365   : > { %1375 = dma.vmem_to_hbm [thread:$0]  (%p1675_p4), %s1235_s30, 512, %s1237_s9, %s1221_s11, %s1593_s18, %s1593_s18, %s1594_s20  }
 0x366 PF: > { %p1381_p6 = scmp.ge.s32.totalorder %s1581_s28, 2  ;;  %s1251_s22 = sand.u32 1, %s1561_s1  }
 0x367   : > { %s1252_s23 = scalar_lea.sflag [#allocation4], %s1251_s22 }
 0x368   : > { %p1378_p7 = pnand %p1381_p6, %p1682_p8 }
 0x36a   : > { %p1379_p9 = pneg %p1378_p7 }
 0x36c   : > { %1556 = dma.done.wait (%p1379_p9), %s1252_s23, 512  }
 0x36d   : > { %1558 = vsyncadd (%p1379_p9), %s1252_s23, 4294966784  ;;  %s20_s28 = sadd.s32 1, %s1581_s28   ;;  %s2213_s1 = smov %s1565_s24 }
 0x36e   : > { %p17_p10 = scmp.ge.s32.totalorder %s20_s28, 4   ;;  %s2214_s24 = smov %s1569_s25 }
 0x36f   : > { %s2215_s25 = smov %s1688_s13  ;;  %s2216_s26 = smov %s1577_s27 }
 0x370   : > { %s2217_s27 = smov %s2219_s8  ;;  %19 = sbr.rel (!%p17_p10) target bundleno = 4 (0x4), region = 86 }
 0x375   :  { %1258 = vsyncpa [#allocation4], 1 }
 0x376   :  { %1260 = vsyncpa [#allocation4 + $0x1], 1 }

</bundles_post_ra>
